<compile_context>
chip_gen: v7x
topology: tpu7x:2x2x1
jax: 0.10.0
libtpu: 0.0.40
codegen_flags: <defaults>
</compile_context>

<pallas_src>
import jax
import jax.numpy as jnp
from jax.experimental import pallas as pl
from jax.experimental.pallas import tpu as pltpu


SUBLANE_BF16 = 16       # bf16 vreg packs (16, 128) -> batch tiles in multiples of 16
MAX_BATCH_TILE = 2048   # x tile = 2048*32*4 B = 256 KB (double-buffered: 512 KB VMEM)


def _round_up(n: int, m: int) -> int:
    return ((n + m - 1) // m) * m


def _cdiv(a: int, b: int) -> int:
    return -(-a // b)


def dqn_kernel(x_ref, w1_ref, b1_ref, w2_ref, b2_ref, w3_ref, b3_ref, o_ref):
    # x tile: (TB, state_size) f32 -> cast to bf16 in-kernel (VPU, hidden under DMA).
    x = x_ref[...].astype(jnp.bfloat16)
    h1 = jnp.dot(x, w1_ref[...], preferred_element_type=jnp.float32)
    h1 = jnp.maximum(h1 + b1_ref[...], 0.0).astype(jnp.bfloat16)
    h2 = jnp.dot(h1, w2_ref[...], preferred_element_type=jnp.float32)
    h2 = jnp.maximum(h2 + b2_ref[...], 0.0).astype(jnp.bfloat16)
    q = jnp.dot(h2, w3_ref[...], preferred_element_type=jnp.float32) + b3_ref[...]
    o_ref[...] = q.astype(o_ref.dtype)


def prepare_params(params):
    """One-time parameter prep (hoisted out of the per-forward path)."""
    w1, b1, w2, b2, w3, b3 = params
    return (w1.astype(jnp.bfloat16), b1.astype(jnp.float32),
            w2.astype(jnp.bfloat16), b2.astype(jnp.float32),
            w3.astype(jnp.bfloat16), b3.astype(jnp.float32))


def _batch_tiling(B: int):
    """Pick (TB, n_tiles, B_pad): big tiles, minimal padding, >=2 even tiles for
    mid/large batches so v7x's 2nd TensorCore always has work."""
    n_tiles = _cdiv(B, MAX_BATCH_TILE)
    if B >= 256:
        n_tiles = max(n_tiles, 2)
    if n_tiles > 1 and n_tiles % 2:
        n_tiles += 1
    TB = _round_up(max(_cdiv(B, n_tiles), 1), SUBLANE_BF16)
    return TB, n_tiles, TB * n_tiles


@jax.jit
def dqn_forward(x, prepped_params):
    """x: (B, state_size) f32.  Returns (B, action_size) f32 Q-values."""
    w1, b1, w2, b2, w3, b3 = prepped_params
    B, state_size = x.shape
    hidden = w1.shape[1]
    action_size = w3.shape[1]

    TB, n_tiles, B_pad = _batch_tiling(B)
    if B_pad != B:
        # Rows only — features stay unpadded (padded rows are sliced off below).
        x = jnp.pad(x, ((0, B_pad - B), (0, 0)))

    row_in = pl.BlockSpec((TB, state_size), lambda i: (i, 0))    # batch-tiled, pipelined
    row_out = pl.BlockSpec((TB, action_size), lambda i: (i, 0))  # narrow f32 output stream
    resident = lambda shape: pl.BlockSpec(shape, lambda i: (0, 0))  # same block every step

    # True (unpadded) work: what the kernel actually streams / computes.
    flops = 2 * B * (state_size * hidden + hidden * hidden + hidden * action_size)
    bytes_accessed = (
        B * state_size * 4                                  # x (f32 in HBM)
        + (w1.size + w2.size + w3.size) * 2                 # bf16 weights
        + (b1.size + b2.size + b3.size) * 4                 # f32 biases
        + B * action_size * 4                               # f32 output
    )

    out = pl.pallas_call(
        dqn_kernel,
        out_shape=jax.ShapeDtypeStruct((B_pad, action_size), jnp.float32),
        grid=(n_tiles,),
        in_specs=[
            row_in,
            resident(w1.shape), resident(b1.shape),
            resident(w2.shape), resident(b2.shape),
            resident(w3.shape), resident(b3.shape),
        ],
        out_specs=row_out,
        compiler_params=pltpu.CompilerParams(
            dimension_semantics=("parallel",),   # shards batch tiles across TCs on v7x
        ),
        cost_estimate=pl.CostEstimate(
            flops=flops, transcendentals=0, bytes_accessed=bytes_accessed
        ),
    )(x, w1, b1, w2, b2, w3, b3)

    return out[:B] if B_pad != B else out


def init_params(key, state_size, action_size, hidden=64):
    # PyTorch nn.Linear default init: U(-1/sqrt(fan_in), 1/sqrt(fan_in)).
    def linear(k, fan_in, fan_out):
        kw, kb = jax.random.split(k)
        bound = 1.0 / jnp.sqrt(jnp.float32(fan_in))
        w = jax.random.uniform(kw, (fan_in, fan_out), jnp.float32, -bound, bound)
        b = jax.random.uniform(kb, (1, fan_out), jnp.float32, -bound, bound)
        return w, b

    k1, k2, k3 = jax.random.split(key, 3)
    w1, b1 = linear(k1, state_size, hidden)
    w2, b2 = linear(k2, hidden, hidden)
    w3, b3 = linear(k3, hidden, action_size)
    return (w1, b1, w2, b2, w3, b3)


def dqn_reference(x, params):
    # Pure-JAX fp32 reference for correctness check.
    w1, b1, w2, b2, w3, b3 = params
    h1 = jnp.maximum(x @ w1 + b1, 0.0)
    h2 = jnp.maximum(h1 @ w2 + b2, 0.0)
    return h2 @ w3 + b3


if __name__ == "__main__":
    state_size = 32   # window of market features
    action_size = 8   # number of trade actions
    batch = 8         # small deterministic example

    key = jax.random.PRNGKey(0)
    k_params, k_x = jax.random.split(key)
    params = init_params(k_params, state_size, action_size)
    prepped = prepare_params(params)   # one-time bf16 weight cast, reused every step
    x = jax.random.normal(k_x, (batch, state_size), jnp.float32)

    out = dqn_forward(x, prepped)
    out = jax.block_until_ready(out)

    ref = dqn_reference(x, params)
    assert out.shape == (batch, action_size)
    # bf16 weights/activations with f32 accumulation -> loose tolerance vs fp32 ref.
    assert jnp.allclose(out, ref, atol=2e-2, rtol=2e-2), (
        f"max abs err {jnp.max(jnp.abs(out - ref))}"
    )
    print("KERNEL_OK")
</pallas_src>

<mosaic_0001>
module attributes {stable_mosaic.version = 11 : i64} {
  func.func @dqn_kernel(%arg0: i32, %arg1: memref<16x32xf32, #tpu.memory_space<vmem>>, %arg2: memref<32x64xbf16, #tpu.memory_space<vmem>>, %arg3: memref<1x64xf32, #tpu.memory_space<vmem>>, %arg4: memref<64x64xbf16, #tpu.memory_space<vmem>>, %arg5: memref<1x64xf32, #tpu.memory_space<vmem>>, %arg6: memref<64x8xbf16, #tpu.memory_space<vmem>>, %arg7: memref<1x8xf32, #tpu.memory_space<vmem>>, %arg8: memref<16x8xf32, #tpu.memory_space<vmem>>) attributes {dimension_semantics = [#tpu.dimension_semantics<parallel>], iteration_bounds = array<i64: 1>, scalar_prefetch = 0 : i64, scratch_operands = 0 : i64, tpu.core_type = #tpu.core_type<tc>, window_params = [{transform_indices = @transform_0, window_bounds = array<i64: 16, 32>}, {pipeline_mode = #tpu.pipeline_mode<synchronous>, transform_indices = @transform_1, window_bounds = array<i64: 32, 64>}, {pipeline_mode = #tpu.pipeline_mode<synchronous>, transform_indices = @transform_2, window_bounds = array<i64: 1, 64>}, {pipeline_mode = #tpu.pipeline_mode<synchronous>, transform_indices = @transform_3, window_bounds = array<i64: 64, 64>}, {pipeline_mode = #tpu.pipeline_mode<synchronous>, transform_indices = @transform_4, window_bounds = array<i64: 1, 64>}, {pipeline_mode = #tpu.pipeline_mode<synchronous>, transform_indices = @transform_5, window_bounds = array<i64: 64, 8>}, {pipeline_mode = #tpu.pipeline_mode<synchronous>, transform_indices = @transform_6, window_bounds = array<i64: 1, 8>}, {transform_indices = @transform_7, window_bounds = array<i64: 16, 8>}]} {
    %c0 = arith.constant 0 : index
    %c0_0 = arith.constant 0 : index
    %0 = vector.load %arg1[%c0, %c0_0] : memref<16x32xf32, #tpu.memory_space<vmem>>, vector<16x32xf32>
    %1 = arith.truncf %0 : vector<16x32xf32> to vector<16x32xbf16>
    %c0_1 = arith.constant 0 : index
    %c0_2 = arith.constant 0 : index
    %2 = vector.load %arg2[%c0_1, %c0_2] : memref<32x64xbf16, #tpu.memory_space<vmem>>, vector<32x64xbf16>
    %cst = arith.constant dense<0.000000e+00> : vector<16x64xf32>
    %3 = tpu.matmul %1, %2, %cst {dimension_numbers = #tpu.dot_dimension_numbers<[1], [0], [0], [1], [0, 0, 1, 1], [], []>} : vector<16x32xbf16>, vector<32x64xbf16>, vector<16x64xf32> -> vector<16x64xf32>
    %c0_3 = arith.constant 0 : index
    %c0_4 = arith.constant 0 : index
    %4 = vector.load %arg3[%c0_3, %c0_4] : memref<1x64xf32, #tpu.memory_space<vmem>>, vector<1x64xf32>
    %5 = vector.broadcast %4 : vector<1x64xf32> to vector<16x64xf32>
    %6 = arith.addf %3, %5 : vector<16x64xf32>
    %cst_5 = arith.constant 0.000000e+00 : f32
    %7 = vector.broadcast %cst_5 : f32 to vector<16x64xf32>
    %8 = arith.maximumf %6, %7 : vector<16x64xf32>
    %9 = arith.truncf %8 : vector<16x64xf32> to vector<16x64xbf16>
    %c0_6 = arith.constant 0 : index
    %c0_7 = arith.constant 0 : index
    %10 = vector.load %arg4[%c0_6, %c0_7] : memref<64x64xbf16, #tpu.memory_space<vmem>>, vector<64x64xbf16>
    %cst_8 = arith.constant dense<0.000000e+00> : vector<16x64xf32>
    %11 = tpu.matmul %9, %10, %cst_8 {dimension_numbers = #tpu.dot_dimension_numbers<[1], [0], [0], [1], [0, 0, 1, 1], [], []>} : vector<16x64xbf16>, vector<64x64xbf16>, vector<16x64xf32> -> vector<16x64xf32>
    %c0_9 = arith.constant 0 : index
    %c0_10 = arith.constant 0 : index
    %12 = vector.load %arg5[%c0_9, %c0_10] : memref<1x64xf32, #tpu.memory_space<vmem>>, vector<1x64xf32>
    %13 = vector.broadcast %12 : vector<1x64xf32> to vector<16x64xf32>
    %14 = arith.addf %11, %13 : vector<16x64xf32>
    %cst_11 = arith.constant 0.000000e+00 : f32
    %15 = vector.broadcast %cst_11 : f32 to vector<16x64xf32>
    %16 = arith.maximumf %14, %15 : vector<16x64xf32>
    %17 = arith.truncf %16 : vector<16x64xf32> to vector<16x64xbf16>
    %c0_12 = arith.constant 0 : index
    %c0_13 = arith.constant 0 : index
    %18 = vector.load %arg6[%c0_12, %c0_13] : memref<64x8xbf16, #tpu.memory_space<vmem>>, vector<64x8xbf16>
    %cst_14 = arith.constant dense<0.000000e+00> : vector<16x8xf32>
    %19 = tpu.matmul %17, %18, %cst_14 {dimension_numbers = #tpu.dot_dimension_numbers<[1], [0], [0], [1], [0, 0, 1, 1], [], []>} : vector<16x64xbf16>, vector<64x8xbf16>, vector<16x8xf32> -> vector<16x8xf32>
    %c0_15 = arith.constant 0 : index
    %c0_16 = arith.constant 0 : index
    %20 = vector.load %arg7[%c0_15, %c0_16] : memref<1x8xf32, #tpu.memory_space<vmem>>, vector<1x8xf32>
    %21 = vector.broadcast %20 : vector<1x8xf32> to vector<16x8xf32>
    %22 = arith.addf %19, %21 : vector<16x8xf32>
    %c0_17 = arith.constant 0 : index
    %c0_18 = arith.constant 0 : index
    %23 = vector.load %arg8[%c0_17, %c0_18] : memref<16x8xf32, #tpu.memory_space<vmem>>, vector<16x8xf32>
    tpu.vector_store %arg8[%c0_17, %c0_18], %22 {strides = array<i32>} : memref<16x8xf32, #tpu.memory_space<vmem>>, vector<16x8xf32>,
    return
  }
  func.func @transform_0(%arg0: i32) -> (i32, i32) {
    %c0_i32 = arith.constant 0 : i32
    %c0_i32_0 = arith.constant 0 : i32
    return %arg0, %c0_i32 : i32, i32
  }
  func.func @transform_1(%arg0: i32) -> (i32, i32) {
    %c0_i32 = arith.constant 0 : i32
    %c0_i32_0 = arith.constant 0 : i32
    %c0_i32_1 = arith.constant 0 : i32
    return %c0_i32, %c0_i32_0 : i32, i32
  }
  func.func @transform_2(%arg0: i32) -> (i32, i32) {
    %c0_i32 = arith.constant 0 : i32
    %c0_i32_0 = arith.constant 0 : i32
    %c0_i32_1 = arith.constant 0 : i32
    return %c0_i32, %c0_i32_0 : i32, i32
  }
  func.func @transform_3(%arg0: i32) -> (i32, i32) {
    %c0_i32 = arith.constant 0 : i32
    %c0_i32_0 = arith.constant 0 : i32
    %c0_i32_1 = arith.constant 0 : i32
    return %c0_i32, %c0_i32_0 : i32, i32
  }
  func.func @transform_4(%arg0: i32) -> (i32, i32) {
    %c0_i32 = arith.constant 0 : i32
    %c0_i32_0 = arith.constant 0 : i32
    %c0_i32_1 = arith.constant 0 : i32
    return %c0_i32, %c0_i32_0 : i32, i32
  }
  func.func @transform_5(%arg0: i32) -> (i32, i32) {
    %c0_i32 = arith.constant 0 : i32
    %c0_i32_0 = arith.constant 0 : i32
    %c0_i32_1 = arith.constant 0 : i32
    return %c0_i32, %c0_i32_0 : i32, i32
  }
  func.func @transform_6(%arg0: i32) -> (i32, i32) {
    %c0_i32 = arith.constant 0 : i32
    %c0_i32_0 = arith.constant 0 : i32
    %c0_i32_1 = arith.constant 0 : i32
    return %c0_i32, %c0_i32_0 : i32, i32
  }
  func.func @transform_7(%arg0: i32) -> (i32, i32) {
    %c0_i32 = arith.constant 0 : i32
    %c0_i32_0 = arith.constant 0 : i32
    return %arg0, %c0_i32 : i32, i32
  }
}

</mosaic_0001>

<bundles_post_ra>
// kernel: dqn_forward.1
= control target key start
LH: loop header
LB: loop body
LE: loop exit
PB: predicated region body
PF: predicated region fallthrough
CT: control target
= control target key end

     0   :  { %v351_v0 = vmov 0.0   ;;  %vm352_vm0 = vmmov 0   ;;  %vm53_vm1 = vcmask 261120   ;;  %vm140_vm2 = vcmask 523264   ;;  %s449_s1 = inlined_call_operand.vmem [shape: bf16[32,64], index: 1, kind: input, shape index: {}]   ;;  %s450_s0 = inlined_call_operand.vmem [shape: f32[16,32], index: 0, kind: input, shape index: {}]   ;;  %s451_s3 = inlined_call_operand.vmem [shape: bf16[64,64], index: 3, kind: input, shape index: {}]   ;;  %s452_s5 = inlined_call_operand.vmem [shape: bf16[64,8], index: 5, kind: input, shape index: {}]   ;;  %s453_s2 = inlined_call_operand.vmem [shape: f32[1,64], index: 2, kind: input, shape index: {}]   ;;  %s454_s4 = inlined_call_operand.vmem [shape: f32[1,64], index: 4, kind: input, shape index: {}]   ;;  %s455_s6 = inlined_call_operand.vmem [shape: f32[1,8], index: 6, kind: input, shape index: {}]   ;;  %s456_s7 = inlined_call_operand.vmem [shape: f32[16,8], index: 7, kind: output, shape index: {}]  }
   0x1   :  { %307 = vmatprep.subr.bf16.mxu0 %v351_v0  ;;  %v341_v1 = vld [vmem:[%s449_s1] sm:$0xff]   ;;  %311 = vmatprep.mubr.msk.bf16.mxu0 %vm352_vm0, %v351_v0  ;;  %v342_v2 = vld [vmem:[%s449_s1 + $0x8] sm:$0xff]   ;;  %v345_v8 = vld [vmem:[%s451_s3 + $0x10] sm:$0xff]   ;;  %vm271_vm3 = vcmask 64512  }
   0x2   :  { %315 = vmatprep.subr.bf16.mxu1 %v351_v0  ;;  %323 = vmatprep.mubr.msk.bf16.mxu1 %vm352_vm0, %v351_v0  ;;  %v27_v3 = vld [vmem:[%s450_s0] sm:$0xff]  ;;  %v28_v4 = vld [vmem:[%s450_s0 + $0x8] sm:$0xff]  ;;  %v346_v9 = vld [vmem:[%s451_s3 + $0x18] sm:$0xff]  }
   0x3   :  { %308 = vmatpush3.bf16.msra.mxu0 %v341_v1  ;;  %v343_v5 = vld [vmem:[%s451_s3] sm:$0xff]   ;;  %v344_v6 = vld [vmem:[%s451_s3 + $0x8] sm:$0xff]   ;;  %v29_v7 = vpack.c.bf16 %v28_v4, %v27_v3  ;;  %v349_v22 = vld [vmem:[%s452_s5 + $0x10] sm:$0xff]  }
   0x4   :  { %309 = vmatprep.subr.bf16.mxu0 %v351_v0  ;;  %316 = vmatpush3.bf16.msra.mxu1 %v343_v5  ;;  %v347_v10 = vld [vmem:[%s452_s5] sm:$0xff]   ;;  %v348_v11 = vld [vmem:[%s452_s5 + $0x8] sm:$0xff]   ;;  %v350_v23 = vld [vmem:[%s452_s5 + $0x18] sm:$0xff]  }
   0x5   :  { %317 = vmatprep.subr.bf16.mxu1 %v351_v0  ;;  %v278_v12 = vld [vmem:[%s453_s2] ss:$0 sm:$0xff] }
   0x6   :  { %v282_v24 = vld [vmem:[%s454_s4] ss:$0 sm:$0xff] }
   0x7   :  { %310 = vmatpush3.bf16.msra.mxu0 %v342_v2  ;;  %v288_v34 = vld [vmem:[%s455_s6] ss:$0 sm:$0xff] }
   0x8   :  { %327 = vmatprep.subr.bf16.mxu0 %v351_v0  ;;  %318 = vmatpush3.bf16.msra.mxu1 %v344_v6 }
   0x9   :  { %319 = vmatprep.subr.bf16.mxu1 %v351_v0 }
   0xa   :  { %312 = vmatmul.mubr.msk.bf16.vlgmr.msra.gmra.mrb[0].mxu0 %vm53_vm1, %v29_v7 }
   0xb   :  { %335 = vmatprep.mubr.msk.bf16.mxu0 %vm352_vm0, %v351_v0  ;;  %328 = vmatpush3.bf16.msra.mxu0 %v347_v10 }
   0xc   :  { %320 = vmatpush3.bf16.msra.mxu1 %v345_v8  ;;  %329 = vmatprep.subr.bf16.mxu0 %v351_v0 }
   0xd   :  { %321 = vmatprep.subr.bf16.mxu1 %v351_v0 }
   0xf   :  { %330 = vmatpush3.bf16.msra.mxu0 %v348_v11 }
  0x10   :  { %322 = vmatpush3.bf16.msra.mxu1 %v346_v9  ;;  %331 = vmatprep.subr.bf16.mxu0 %v351_v0 }
  0x13   :  { %332 = vmatpush3.bf16.msra.mxu0 %v349_v22 }
  0x14   :  { %333 = vmatprep.subr.bf16.mxu0 %v351_v0 }
  0x17   :  { %334 = vmatpush3.bf16.msra.mxu0 %v350_v23 }
  0xdd   :  { %v91_v13 = vpop.f32.mrb[0].mxu0 }
  0xde   :  { %v92_v14 = vadd.f32 %v278_v12, %v91_v13  ;;  %v313_v15 = vpop.f32.mrb[1].mxu0 }
  0xdf   :  { %v94_v16 = vpop.f32.mrb[2].mxu0 }
  0xe0   :  { %v95_v17 = vadd.f32 %v278_v12, %v94_v16  ;;  %v314_v18 = vpop.f32.mrb[3].mxu0  ;;  %v98_v19 = vmax.f32 %v92_v14, 0.0 }
  0xe2   :  { %v99_v20 = vmax.f32 %v95_v17, 0.0 }
  0xe4   :  { %v100_v21 = vpack.c.bf16 %v99_v20, %v98_v19 }
  0xe6   :  { %324 = vmatmul.mubr.msk.bf16.vlgmr.msra.gmra.mrb[0].mxu1 %vm140_vm2, %v100_v21 }
 0x1b9   :  { %v178_v25 = vpop.f32.mrb[0].mxu1 }
 0x1ba   :  { %v179_v26 = vadd.f32 %v282_v24, %v178_v25  ;;  %v325_v27 = vpop.f32.mrb[1].mxu1 }
 0x1bb   :  { %v181_v28 = vpop.f32.mrb[2].mxu1 }
 0x1bc   :  { %v182_v29 = vadd.f32 %v282_v24, %v181_v28  ;;  %v326_v30 = vpop.f32.mrb[3].mxu1  ;;  %v185_v31 = vmax.f32 %v179_v26, 0.0 }
 0x1be   :  { %v186_v32 = vmax.f32 %v182_v29, 0.0 }
 0x1c0   :  { %v187_v33 = vpack.c.bf16 %v186_v32, %v185_v31 }
 0x1c2   :  { %336 = vmatmul.mubr.msk.bf16.vlgmr.msra.gmra.mrb[4].mxu0 %vm140_vm2, %v187_v33 }
 0x295   :  { %v264_v35 = vpop.f32.mrb[4].mxu0 }
 0x296   :  { %v265_v36 = vadd.f32 %v288_v34, %v264_v35  ;;  %v337_v37 = vpop.f32.mrb[5].mxu0 }
 0x297   :  { %v267_v38 = vpop.f32.mrb[6].mxu0 }
 0x298   :  { %272 = vst.msk [vmem:[%s456_s7] sm:$0xff] %vm271_vm3, %v265_v36  ;;  %v268_v39 = vadd.f32 %v288_v34, %v267_v38  ;;  %v338_v40 = vpop.f32.mrb[7].mxu0 }
 0x29a   :  { %273 = vst.msk [vmem:[%s456_s7 + $0x8] sm:$0xff] %vm271_vm3, %v268_v39 }

</bundles_post_ra>
